<compile_context>
chip_gen: v7x
topology: tpu7x:2x2x1
jax: 0.10.0
libtpu: 0.0.40
codegen_flags: <defaults>
</compile_context>

<pallas_src>
import functools

import jax
import jax.numpy as jnp
import numpy as np
from jax.experimental import pallas as pl
from jax.experimental.pallas import tpu as pltpu


_TAPS = ((-1, -1), (-1, 0), (-1, 1),
         (0, -1),  (0, 0),  (0, 1),
         (1, -1),  (1, 0),  (1, 1))


def _silu(v):
    # sigmoid via EUP exp + EUP reciprocal (keeps the divide off the VALU).
    return v * pl.reciprocal(1.0 + jnp.exp(-v), approx=False)


def _silu_ref(v):
    # plain-JAX SiLU for the reference path (outside Pallas).
    return v * (1.0 / (1.0 + jnp.exp(-v)))


def _c2ft_kernel(x_ref, pos_ref, w1_ref, b1_ref, wdw_ref, bdw_ref, w2_ref,
                 b2_ref, o_ref, *, H, W):
    """Whole C2ft forward for one batch element in (C, H*W) layout."""
    c1 = x_ref.shape[1]
    ch = c1 // 2
    HW = H * W

    x = x_ref[0]                       # (c1, HW), matmul dtype
    x0 = x[:ch, :]                     # passthrough chunk
    x1 = x[ch:, :]                     # bottleneck chunk

    # ---- Bottleneck.cv1: 1x1 conv == (ch, ch) @ (ch, HW), folded BN, SiLU.
    h = jnp.dot(w1_ref[...], x1, preferred_element_type=jnp.float32)
    h = _silu(h + b1_ref[...])         # (ch, HW) float32

    # ---- Bottleneck.cv2: depthwise 3x3 (padding=1) fully in registers.
    # Border masks from prefetched (col, row) lane indices.
    col = jnp.broadcast_to(pos_ref[0:1, :], (ch, HW))
    row = jnp.broadcast_to(pos_ref[1:2, :], (ch, HW))
    not_left = col >= 1
    not_right = col <= W - 2
    not_top = row >= 1
    not_bottom = row <= H - 2

    acc = jnp.zeros((ch, HW), jnp.float32)
    for k, (oy, ox) in enumerate(_TAPS):
        off = oy * W + ox
        shifted = h if off == 0 else pltpu.roll(h, shift=(-off) % HW, axis=1)
        mask = None
        if oy == -1:
            mask = not_top
        elif oy == 1:
            mask = not_bottom
        if ox == -1:
            mask = not_left if mask is None else (mask & not_left)
        elif ox == 1:
            mask = not_right if mask is None else (mask & not_right)
        tap = shifted if mask is None else jnp.where(mask, shifted, 0.0)
        acc = acc + tap * wdw_ref[:, k:k + 1]          # per-channel tap weight
    d = _silu(acc + bdw_ref[...])       # (ch, HW) float32

    # ---- C2ft.cv2: single fused (c2, c1) @ (c1, HW) matmul on concat([x0, d]).
    cat = jnp.concatenate([x0, d.astype(x.dtype)], axis=0)   # (c1, HW)
    y = jnp.dot(w2_ref[...], cat, preferred_element_type=jnp.float32)
    o_ref[0] = _silu(y + b2_ref[...])   # lane-dense (c2, HW) store


def c2ft_pallas(x_nchw, params, matmul_dtype=jnp.float32):
    """x_nchw: (B, c1, H, W) float32 -> (B, c2, H, W) float32.

    matmul_dtype: jnp.float32, or jnp.bfloat16 to run the MXU contractions in
    bf16 (recommended on v6e/v7x); depthwise + SiLU stay in float32 either way.
    """
    B, c1, H, W = x_nchw.shape
    ch = c1 // 2
    HW = H * W
    c2 = params["w2"].shape[0]

    x = x_nchw.reshape(B, c1, HW).astype(matmul_dtype)   # free reshape, no transpose
    w1 = params["w1"].astype(matmul_dtype)
    w2 = params["w2"].astype(matmul_dtype)
    b1, wdw, bdw, b2 = params["b1"], params["wdw"], params["bdw"], params["b2"]

    lane = jnp.arange(HW, dtype=jnp.int32)
    pos = jnp.stack([lane % W, lane // W], axis=0)        # (2, HW): col, row

    kernel = functools.partial(_c2ft_kernel, H=H, W=W)
    out = pl.pallas_call(
        kernel,
        out_shape=jax.ShapeDtypeStruct((B, c2, HW), jnp.float32),
        grid_spec=pltpu.PrefetchScalarGridSpec(
            num_scalar_prefetch=0,
            grid=(B,),
            in_specs=[
                pl.BlockSpec((1, c1, HW), lambda b: (b, 0, 0)),
                pl.BlockSpec((2, HW), lambda b: (0, 0)),
                pl.BlockSpec((ch, ch), lambda b: (0, 0)),
                pl.BlockSpec((ch, 1), lambda b: (0, 0)),
                pl.BlockSpec((ch, 9), lambda b: (0, 0)),
                pl.BlockSpec((ch, 1), lambda b: (0, 0)),
                pl.BlockSpec((c2, c1), lambda b: (0, 0)),
                pl.BlockSpec((c2, 1), lambda b: (0, 0)),
            ],
            out_specs=pl.BlockSpec((1, c2, HW), lambda b: (b, 0, 0)),
        ),
        compiler_params=pltpu.CompilerParams(
            dimension_semantics=("parallel",)),   # B>=2 feeds both v7x cores
    )(x, pos, w1, b1, wdw, bdw, w2, b2)
    return out.reshape(B, c2, H, W)


def init_params(key, c1, c2):
    """Deterministic synthetic conv + BN params; returns (raw, bn-folded)."""
    ch = c1 // 2
    ks = jax.random.split(key, 6)
    eps = 1e-5

    def bn(k, c):
        k1, k2, k3, k4 = jax.random.split(k, 4)
        gamma = jax.random.uniform(k1, (c,), minval=0.5, maxval=1.5)
        beta = 0.1 * jax.random.normal(k2, (c,))
        mean = 0.1 * jax.random.normal(k3, (c,))
        var = jax.random.uniform(k4, (c,), minval=0.5, maxval=1.5)
        return gamma, beta, mean, var

    w1_mat = 0.3 * jax.random.normal(ks[0], (ch, ch), dtype=jnp.float32)   # (cin, cout)
    wdw = 0.3 * jax.random.normal(ks[1], (3, 3, ch), dtype=jnp.float32)    # (ky, kx, c)
    w2_mat = 0.3 * jax.random.normal(ks[2], (c1, c2), dtype=jnp.float32)   # (cin, cout)
    bn1, bndw, bn2 = bn(ks[3], ch), bn(ks[4], ch), bn(ks[5], c2)

    raw = dict(w1_mat=w1_mat, wdw=wdw, w2_mat=w2_mat, bn1=bn1, bndw=bndw, bn2=bn2)

    def fold(gamma, beta, mean, var):
        s = gamma / jnp.sqrt(var + eps)
        return s, beta - mean * s

    s1, bb1 = fold(*bn1)
    sdw, bbdw = fold(*bndw)
    s2, bb2 = fold(*bn2)
    folded = dict(
        # matmul weights stored (c_out, c_in) for the (C, H*W) kernel layout
        w1=(w1_mat * s1[None, :]).T,                                   # (ch, ch)
        b1=bb1[:, None],                                               # (ch, 1)
        # depthwise taps stored (c, 9) with k = ky*3 + kx
        wdw=jnp.transpose(wdw * sdw[None, None, :], (2, 0, 1)).reshape(ch, 9),
        bdw=bbdw[:, None],                                             # (ch, 1)
        w2=(w2_mat * s2[None, :]).T,                                   # (c2, c1)
        b2=bb2[:, None],                                               # (c2, 1)
    )
    return raw, folded


def c2ft_reference(x_nchw, raw):
    """Independent pure-JAX reference (lax.conv + explicit eval-mode BN)."""
    eps = 1e-5
    x = jnp.transpose(x_nchw, (0, 2, 3, 1))
    c1 = x.shape[-1]
    ch = c1 // 2

    def conv_bn_silu(inp, w_hwio, bn_params, groups=1):
        gamma, beta, mean, var = bn_params
        y = jax.lax.conv_general_dilated(
            inp, w_hwio, (1, 1), "SAME",
            dimension_numbers=("NHWC", "HWIO", "NHWC"),
            feature_group_count=groups)
        y = (y - mean) / jnp.sqrt(var + eps) * gamma + beta
        return _silu_ref(y)

    x0, x1 = x[..., :ch], x[..., ch:]
    h = conv_bn_silu(x1, raw["w1_mat"][None, None], raw["bn1"])
    d = conv_bn_silu(h, raw["wdw"][:, :, None, :], raw["bndw"], groups=ch)
    cat = jnp.concatenate([x0, d], axis=-1)
    out = conv_bn_silu(cat, raw["w2_mat"][None, None], raw["bn2"])
    return jnp.transpose(out, (0, 3, 1, 2))


if __name__ == "__main__":
    key = jax.random.PRNGKey(0)
    kx, kp = jax.random.split(key)
    B, c1, c2, H, W = 2, 16, 32, 16, 16        # C2ft(c1=16, c2=32, n=1)
    x = jax.random.normal(kx, (B, c1, H, W), dtype=jnp.float32)
    raw, folded = init_params(kp, c1, c2)

    ref = jax.block_until_ready(c2ft_reference(x, raw))

    # float32 path: strict check.
    out_f32 = jax.block_until_ready(c2ft_pallas(x, folded, jnp.float32))
    np.testing.assert_allclose(np.asarray(out_f32), np.asarray(ref),
                               rtol=2e-4, atol=2e-4)

    # bf16-matmul path (v6e/v7x MXU): looser check for bf16 operand rounding.
    out_bf16 = jax.block_until_ready(c2ft_pallas(x, folded, jnp.bfloat16))
    np.testing.assert_allclose(np.asarray(out_bf16), np.asarray(ref),
                               rtol=3e-2, atol=3e-2)

    print("KERNEL_OK")
</pallas_src>

<mosaic_0001>
module attributes {stable_mosaic.version = 11 : i64} {
  func.func @_c2ft_kernel(%arg0: i32, %arg1: memref<1x16x256xf32, #tpu.memory_space<vmem>>, %arg2: memref<2x256xi32, #tpu.memory_space<vmem>>, %arg3: memref<8x8xf32, #tpu.memory_space<vmem>>, %arg4: memref<8x1xf32, #tpu.memory_space<vmem>>, %arg5: memref<8x9xf32, #tpu.memory_space<vmem>>, %arg6: memref<8x1xf32, #tpu.memory_space<vmem>>, %arg7: memref<32x16xf32, #tpu.memory_space<vmem>>, %arg8: memref<32x1xf32, #tpu.memory_space<vmem>>, %arg9: memref<1x32x256xf32, #tpu.memory_space<vmem>>) attributes {dimension_semantics = [#tpu.dimension_semantics<parallel>], iteration_bounds = array<i64: 2>, scalar_prefetch = 0 : i64, scratch_operands = 0 : i64, tpu.core_type = #tpu.core_type<tc>, window_params = [{transform_indices = @transform_0, window_bounds = array<i64: 1, 16, 256>}, {pipeline_mode = #tpu.pipeline_mode<synchronous>, transform_indices = @transform_1, window_bounds = array<i64: 2, 256>}, {pipeline_mode = #tpu.pipeline_mode<synchronous>, transform_indices = @transform_2, window_bounds = array<i64: 8, 8>}, {pipeline_mode = #tpu.pipeline_mode<synchronous>, transform_indices = @transform_3, window_bounds = array<i64: 8, 1>}, {pipeline_mode = #tpu.pipeline_mode<synchronous>, transform_indices = @transform_4, window_bounds = array<i64: 8, 9>}, {pipeline_mode = #tpu.pipeline_mode<synchronous>, transform_indices = @transform_5, window_bounds = array<i64: 8, 1>}, {pipeline_mode = #tpu.pipeline_mode<synchronous>, transform_indices = @transform_6, window_bounds = array<i64: 32, 16>}, {pipeline_mode = #tpu.pipeline_mode<synchronous>, transform_indices = @transform_7, window_bounds = array<i64: 32, 1>}, {transform_indices = @transform_8, window_bounds = array<i64: 1, 32, 256>}]} {
    %c0 = arith.constant 0 : index
    %c0_0 = arith.constant 0 : index
    %c0_1 = arith.constant 0 : index
    %0 = vector.load %arg1[%c0, %c0_0, %c0_1] : memref<1x16x256xf32, #tpu.memory_space<vmem>>, vector<1x16x256xf32>
    %1 = vector.shape_cast %0 : vector<1x16x256xf32> to vector<16x256xf32>
    %2 = vector.extract_strided_slice %1 {offsets = [0, 0], sizes = [8, 256], strides = [1, 1]} : vector<16x256xf32> to vector<8x256xf32>
    %3 = vector.extract_strided_slice %1 {offsets = [8, 0], sizes = [8, 256], strides = [1, 1]} : vector<16x256xf32> to vector<8x256xf32>
    %c0_2 = arith.constant 0 : index
    %c0_3 = arith.constant 0 : index
    %4 = vector.load %arg3[%c0_2, %c0_3] : memref<8x8xf32, #tpu.memory_space<vmem>>, vector<8x8xf32>
    %cst = arith.constant dense<0.000000e+00> : vector<8x256xf32>
    %5 = tpu.matmul %4, %3, %cst {dimension_numbers = #tpu.dot_dimension_numbers<[1], [0], [0], [1], [0, 0, 1, 1], [], []>} : vector<8x8xf32>, vector<8x256xf32>, vector<8x256xf32> -> vector<8x256xf32>
    %c0_4 = arith.constant 0 : index
    %c0_5 = arith.constant 0 : index
    %6 = vector.load %arg4[%c0_4, %c0_5] : memref<8x1xf32, #tpu.memory_space<vmem>>, vector<8x1xf32>
    %7 = vector.broadcast %6 : vector<8x1xf32> to vector<8x256xf32>
    %8 = arith.addf %5, %7 : vector<8x256xf32>
    %cst_6 = arith.constant 0.000000e+00 : f32
    %9 = vector.broadcast %cst_6 : f32 to vector<8x256xf32>
    %10 = arith.subf %9, %8 : vector<8x256xf32>
    %11 = math.exp %10 : vector<8x256xf32>
    %cst_7 = arith.constant 1.000000e+00 : f32
    %12 = vector.broadcast %cst_7 : f32 to vector<8x256xf32>
    %13 = arith.addf %12, %11 : vector<8x256xf32>
    %14 = tpu.reciprocal %13 : vector<8x256xf32> -> vector<8x256xf32>
    %15 = arith.mulf %8, %14 : vector<8x256xf32>
    %c0_8 = arith.constant 0 : index
    %c0_9 = arith.constant 0 : index
    %16 = vector.load %arg2[%c0_8, %c0_9] : memref<2x256xi32, #tpu.memory_space<vmem>>, vector<1x256xi32>
    %17 = vector.shape_cast %16 : vector<1x256xi32> to vector<1x256xi32>
    %18 = vector.broadcast %17 : vector<1x256xi32> to vector<8x256xi32>
    %c1 = arith.constant 1 : index
    %c0_10 = arith.constant 0 : index
    %19 = vector.load %arg2[%c1, %c0_10] : memref<2x256xi32, #tpu.memory_space<vmem>>, vector<1x256xi32>
    %20 = vector.shape_cast %19 : vector<1x256xi32> to vector<1x256xi32>
    %21 = vector.broadcast %20 : vector<1x256xi32> to vector<8x256xi32>
    %c1_i32 = arith.constant 1 : i32
    %22 = vector.broadcast %c1_i32 : i32 to vector<8x256xi32>
    %23 = arith.cmpi sge, %18, %22 : vector<8x256xi32>
    %c14_i32 = arith.constant 14 : i32
    %24 = vector.broadcast %c14_i32 : i32 to vector<8x256xi32>
    %25 = arith.cmpi sle, %18, %24 : vector<8x256xi32>
    %c1_i32_11 = arith.constant 1 : i32
    %26 = vector.broadcast %c1_i32_11 : i32 to vector<8x256xi32>
    %27 = arith.cmpi sge, %21, %26 : vector<8x256xi32>
    %c14_i32_12 = arith.constant 14 : i32
    %28 = vector.broadcast %c14_i32_12 : i32 to vector<8x256xi32>
    %29 = arith.cmpi sle, %21, %28 : vector<8x256xi32>
    %cst_13 = arith.constant 0.000000e+00 : f32
    %30 = vector.broadcast %cst_13 : f32 to vector<8x256xf32>
    %c17_i32 = arith.constant 17 : i32
    %31 = tpu.dynamic_rotate %15 by %c17_i32 dim 1 : vector<8x256xf32>, i32 -> vector<8x256xf32>
    %32 = arith.andi %27, %23 : vector<8x256xi1>
    %cst_14 = arith.constant 0.000000e+00 : f32
    %33 = vector.broadcast %cst_14 : f32 to vector<8x256xf32>
    %34 = arith.select %32, %31, %33 : vector<8x256xi1>, vector<8x256xf32>
    %c0_15 = arith.constant 0 : index
    %c0_16 = arith.constant 0 : index
    %35 = vector.load %arg5[%c0_15, %c0_16] : memref<8x9xf32, #tpu.memory_space<vmem>>, vector<8x1xf32>
    %36 = vector.broadcast %35 : vector<8x1xf32> to vector<8x256xf32>
    %37 = arith.mulf %34, %36 : vector<8x256xf32>
    %38 = arith.addf %30, %37 : vector<8x256xf32>
    %c16_i32 = arith.constant 16 : i32
    %39 = tpu.dynamic_rotate %15 by %c16_i32 dim 1 : vector<8x256xf32>, i32 -> vector<8x256xf32>
    %cst_17 = arith.constant 0.000000e+00 : f32
    %40 = vector.broadcast %cst_17 : f32 to vector<8x256xf32>
    %41 = arith.select %27, %39, %40 : vector<8x256xi1>, vector<8x256xf32>
    %c0_18 = arith.constant 0 : index
    %c1_19 = arith.constant 1 : index
    %42 = vector.load %arg5[%c0_18, %c1_19] : memref<8x9xf32, #tpu.memory_space<vmem>>, vector<8x1xf32>
    %43 = vector.broadcast %42 : vector<8x1xf32> to vector<8x256xf32>
    %44 = arith.mulf %41, %43 : vector<8x256xf32>
    %45 = arith.addf %38, %44 : vector<8x256xf32>
    %c15_i32 = arith.constant 15 : i32
    %46 = tpu.dynamic_rotate %15 by %c15_i32 dim 1 : vector<8x256xf32>, i32 -> vector<8x256xf32>
    %47 = arith.andi %27, %25 : vector<8x256xi1>
    %cst_20 = arith.constant 0.000000e+00 : f32
    %48 = vector.broadcast %cst_20 : f32 to vector<8x256xf32>
    %49 = arith.select %47, %46, %48 : vector<8x256xi1>, vector<8x256xf32>
    %c0_21 = arith.constant 0 : index
    %c2 = arith.constant 2 : index
    %50 = vector.load %arg5[%c0_21, %c2] : memref<8x9xf32, #tpu.memory_space<vmem>>, vector<8x1xf32>
    %51 = vector.broadcast %50 : vector<8x1xf32> to vector<8x256xf32>
    %52 = arith.mulf %49, %51 : vector<8x256xf32>
    %53 = arith.addf %45, %52 : vector<8x256xf32>
    %c1_i32_22 = arith.constant 1 : i32
    %54 = tpu.dynamic_rotate %15 by %c1_i32_22 dim 1 : vector<8x256xf32>, i32 -> vector<8x256xf32>
    %cst_23 = arith.constant 0.000000e+00 : f32
    %55 = vector.broadcast %cst_23 : f32 to vector<8x256xf32>
    %56 = arith.select %23, %54, %55 : vector<8x256xi1>, vector<8x256xf32>
    %c0_24 = arith.constant 0 : index
    %c3 = arith.constant 3 : index
    %57 = vector.load %arg5[%c0_24, %c3] : memref<8x9xf32, #tpu.memory_space<vmem>>, vector<8x1xf32>
    %58 = vector.broadcast %57 : vector<8x1xf32> to vector<8x256xf32>
    %59 = arith.mulf %56, %58 : vector<8x256xf32>
    %60 = arith.addf %53, %59 : vector<8x256xf32>
    %c0_25 = arith.constant 0 : index
    %c4 = arith.constant 4 : index
    %61 = vector.load %arg5[%c0_25, %c4] : memref<8x9xf32, #tpu.memory_space<vmem>>, vector<8x1xf32>
    %62 = vector.broadcast %61 : vector<8x1xf32> to vector<8x256xf32>
    %63 = arith.mulf %15, %62 : vector<8x256xf32>
    %64 = arith.addf %60, %63 : vector<8x256xf32>
    %c255_i32 = arith.constant 255 : i32
    %65 = tpu.dynamic_rotate %15 by %c255_i32 dim 1 : vector<8x256xf32>, i32 -> vector<8x256xf32>
    %cst_26 = arith.constant 0.000000e+00 : f32
    %66 = vector.broadcast %cst_26 : f32 to vector<8x256xf32>
    %67 = arith.select %25, %65, %66 : vector<8x256xi1>, vector<8x256xf32>
    %c0_27 = arith.constant 0 : index
    %c5 = arith.constant 5 : index
    %68 = vector.load %arg5[%c0_27, %c5] : memref<8x9xf32, #tpu.memory_space<vmem>>, vector<8x1xf32>
    %69 = vector.broadcast %68 : vector<8x1xf32> to vector<8x256xf32>
    %70 = arith.mulf %67, %69 : vector<8x256xf32>
    %71 = arith.addf %64, %70 : vector<8x256xf32>
    %c241_i32 = arith.constant 241 : i32
    %72 = tpu.dynamic_rotate %15 by %c241_i32 dim 1 : vector<8x256xf32>, i32 -> vector<8x256xf32>
    %73 = arith.andi %29, %23 : vector<8x256xi1>
    %cst_28 = arith.constant 0.000000e+00 : f32
    %74 = vector.broadcast %cst_28 : f32 to vector<8x256xf32>
    %75 = arith.select %73, %72, %74 : vector<8x256xi1>, vector<8x256xf32>
    %c0_29 = arith.constant 0 : index
    %c6 = arith.constant 6 : index
    %76 = vector.load %arg5[%c0_29, %c6] : memref<8x9xf32, #tpu.memory_space<vmem>>, vector<8x1xf32>
    %77 = vector.broadcast %76 : vector<8x1xf32> to vector<8x256xf32>
    %78 = arith.mulf %75, %77 : vector<8x256xf32>
    %79 = arith.addf %71, %78 : vector<8x256xf32>
    %c240_i32 = arith.constant 240 : i32
    %80 = tpu.dynamic_rotate %15 by %c240_i32 dim 1 : vector<8x256xf32>, i32 -> vector<8x256xf32>
    %cst_30 = arith.constant 0.000000e+00 : f32
    %81 = vector.broadcast %cst_30 : f32 to vector<8x256xf32>
    %82 = arith.select %29, %80, %81 : vector<8x256xi1>, vector<8x256xf32>
    %c0_31 = arith.constant 0 : index
    %c7 = arith.constant 7 : index
    %83 = vector.load %arg5[%c0_31, %c7] : memref<8x9xf32, #tpu.memory_space<vmem>>, vector<8x1xf32>
    %84 = vector.broadcast %83 : vector<8x1xf32> to vector<8x256xf32>
    %85 = arith.mulf %82, %84 : vector<8x256xf32>
    %86 = arith.addf %79, %85 : vector<8x256xf32>
    %c239_i32 = arith.constant 239 : i32
    %87 = tpu.dynamic_rotate %15 by %c239_i32 dim 1 : vector<8x256xf32>, i32 -> vector<8x256xf32>
    %88 = arith.andi %29, %25 : vector<8x256xi1>
    %cst_32 = arith.constant 0.000000e+00 : f32
    %89 = vector.broadcast %cst_32 : f32 to vector<8x256xf32>
    %90 = arith.select %88, %87, %89 : vector<8x256xi1>, vector<8x256xf32>
    %c0_33 = arith.constant 0 : index
    %c8 = arith.constant 8 : index
    %91 = vector.load %arg5[%c0_33, %c8] : memref<8x9xf32, #tpu.memory_space<vmem>>, vector<8x1xf32>
    %92 = vector.broadcast %91 : vector<8x1xf32> to vector<8x256xf32>
    %93 = arith.mulf %90, %92 : vector<8x256xf32>
    %94 = arith.addf %86, %93 : vector<8x256xf32>
    %c0_34 = arith.constant 0 : index
    %c0_35 = arith.constant 0 : index
    %95 = vector.load %arg6[%c0_34, %c0_35] : memref<8x1xf32, #tpu.memory_space<vmem>>, vector<8x1xf32>
    %96 = vector.broadcast %95 : vector<8x1xf32> to vector<8x256xf32>
    %97 = arith.addf %94, %96 : vector<8x256xf32>
    %cst_36 = arith.constant 0.000000e+00 : f32
    %98 = vector.broadcast %cst_36 : f32 to vector<8x256xf32>
    %99 = arith.subf %98, %97 : vector<8x256xf32>
    %100 = math.exp %99 : vector<8x256xf32>
    %cst_37 = arith.constant 1.000000e+00 : f32
    %101 = vector.broadcast %cst_37 : f32 to vector<8x256xf32>
    %102 = arith.addf %101, %100 : vector<8x256xf32>
    %103 = tpu.reciprocal %102 : vector<8x256xf32> -> vector<8x256xf32>
    %104 = arith.mulf %97, %103 : vector<8x256xf32>
    %105 = tpu.concatenate %2, %104 in 0 : vector<8x256xf32>, vector<8x256xf32> -> vector<16x256xf32>
    %c0_38 = arith.constant 0 : index
    %c0_39 = arith.constant 0 : index
    %106 = vector.load %arg7[%c0_38, %c0_39] : memref<32x16xf32, #tpu.memory_space<vmem>>, vector<32x16xf32>
    %cst_40 = arith.constant dense<0.000000e+00> : vector<32x256xf32>
    %107 = tpu.matmul %106, %105, %cst_40 {dimension_numbers = #tpu.dot_dimension_numbers<[1], [0], [0], [1], [0, 0, 1, 1], [], []>} : vector<32x16xf32>, vector<16x256xf32>, vector<32x256xf32> -> vector<32x256xf32>
    %c0_41 = arith.constant 0 : index
    %c0_42 = arith.constant 0 : index
    %108 = vector.load %arg8[%c0_41, %c0_42] : memref<32x1xf32, #tpu.memory_space<vmem>>, vector<32x1xf32>
    %109 = vector.broadcast %108 : vector<32x1xf32> to vector<32x256xf32>
    %110 = arith.addf %107, %109 : vector<32x256xf32>
    %cst_43 = arith.constant 0.000000e+00 : f32
    %111 = vector.broadcast %cst_43 : f32 to vector<32x256xf32>
    %112 = arith.subf %111, %110 : vector<32x256xf32>
    %113 = math.exp %112 : vector<32x256xf32>
    %cst_44 = arith.constant 1.000000e+00 : f32
    %114 = vector.broadcast %cst_44 : f32 to vector<32x256xf32>
    %115 = arith.addf %114, %113 : vector<32x256xf32>
    %116 = tpu.reciprocal %115 : vector<32x256xf32> -> vector<32x256xf32>
    %117 = arith.mulf %110, %116 : vector<32x256xf32>
    %c0_45 = arith.constant 0 : index
    %c0_46 = arith.constant 0 : index
    %c0_47 = arith.constant 0 : index
    %118 = vector.load %arg9[%c0_45, %c0_46, %c0_47] : memref<1x32x256xf32, #tpu.memory_space<vmem>>, vector<1x32x256xf32>
    %119 = vector.shape_cast %118 : vector<1x32x256xf32> to vector<32x256xf32>
    %120 = vector.shape_cast %117 : vector<32x256xf32> to vector<1x32x256xf32>
    tpu.vector_store %arg9[%c0_45, %c0_46, %c0_47], %120 {strides = array<i32>} : memref<1x32x256xf32, #tpu.memory_space<vmem>>, vector<1x32x256xf32>,
    return
  }
  func.func @transform_0(%arg0: i32) -> (i32, i32, i32) {
    %c0_i32 = arith.constant 0 : i32
    %c0_i32_0 = arith.constant 0 : i32
    %c0_i32_1 = arith.constant 0 : i32
    return %arg0, %c0_i32, %c0_i32_0 : i32, i32, i32
  }
  func.func @transform_1(%arg0: i32) -> (i32, i32) {
    %c0_i32 = arith.constant 0 : i32
    %c0_i32_0 = arith.constant 0 : i32
    %c0_i32_1 = arith.constant 0 : i32
    return %c0_i32, %c0_i32_0 : i32, i32
  }
  func.func @transform_2(%arg0: i32) -> (i32, i32) {
    %c0_i32 = arith.constant 0 : i32
    %c0_i32_0 = arith.constant 0 : i32
    %c0_i32_1 = arith.constant 0 : i32
    return %c0_i32, %c0_i32_0 : i32, i32
  }
  func.func @transform_3(%arg0: i32) -> (i32, i32) {
    %c0_i32 = arith.constant 0 : i32
    %c0_i32_0 = arith.constant 0 : i32
    %c0_i32_1 = arith.constant 0 : i32
    return %c0_i32, %c0_i32_0 : i32, i32
  }
  func.func @transform_4(%arg0: i32) -> (i32, i32) {
    %c0_i32 = arith.constant 0 : i32
    %c0_i32_0 = arith.constant 0 : i32
    %c0_i32_1 = arith.constant 0 : i32
    return %c0_i32, %c0_i32_0 : i32, i32
  }
  func.func @transform_5(%arg0: i32) -> (i32, i32) {
    %c0_i32 = arith.constant 0 : i32
    %c0_i32_0 = arith.constant 0 : i32
    %c0_i32_1 = arith.constant 0 : i32
    return %c0_i32, %c0_i32_0 : i32, i32
  }
  func.func @transform_6(%arg0: i32) -> (i32, i32) {
    %c0_i32 = arith.constant 0 : i32
    %c0_i32_0 = arith.constant 0 : i32
    %c0_i32_1 = arith.constant 0 : i32
    return %c0_i32, %c0_i32_0 : i32, i32
  }
  func.func @transform_7(%arg0: i32) -> (i32, i32) {
    %c0_i32 = arith.constant 0 : i32
    %c0_i32_0 = arith.constant 0 : i32
    %c0_i32_1 = arith.constant 0 : i32
    return %c0_i32, %c0_i32_0 : i32, i32
  }
  func.func @transform_8(%arg0: i32) -> (i32, i32, i32) {
    %c0_i32 = arith.constant 0 : i32
    %c0_i32_0 = arith.constant 0 : i32
    %c0_i32_1 = arith.constant 0 : i32
    return %arg0, %c0_i32, %c0_i32_0 : i32, i32, i32
  }
}

</mosaic_0001>

<bundles_post_ra>
// kernel: tpu_custom_call.1
= control target key start
LH: loop header
LB: loop body
LE: loop exit
PB: predicated region body
PF: predicated region fallthrough
CT: control target
= control target key end

     0   :  { %s1482_s0 = inlined_call_operand.vmem [shape: f32[2,16,256], index: 0, kind: input, shape index: {}]   ;;  %s1483_s1 = inlined_call_operand.vmem [shape: s32[2,256], index: 1, kind: input, shape index: {}]   ;;  %s1484_s2 = inlined_call_operand.vmem [shape: f32[8,8], index: 2, kind: input, shape index: {}]   ;;  %s1485_s3 = inlined_call_operand.vmem [shape: f32[8,1], index: 3, kind: input, shape index: {}]   ;;  %s1486_s4 = inlined_call_operand.vmem [shape: f32[8,9], index: 4, kind: input, shape index: {}]   ;;  %s1487_s5 = inlined_call_operand.vmem [shape: f32[8,1], index: 5, kind: input, shape index: {}]   ;;  %s1488_s6 = inlined_call_operand.vmem [shape: f32[32,16], index: 6, kind: input, shape index: {}]   ;;  %s1489_s7 = inlined_call_operand.vmem [shape: f32[32,1], index: 7, kind: input, shape index: {}]   ;;  %s1490_s8 = inlined_call_operand.hbm [shape: f32[2,32,256], index: 8, kind: output, shape index: {}]  }
   0x1   :  { %1491 = sst [smem:[#allocation5_spill]] %s1482_s0 }
   0x2   :  { %13 = vsyncpa [#allocation3], 0 }
   0x3   :  { %15 = vsyncpa [#allocation3 + $0x1], 0  ;;  %s1139_s27 = smov 0   ;;  %s1141_s28 = smov 0  }
   0x4   :  { %s1143_s29 = smov 0   ;;  %s1145_s30 = smov 0  }
   0x5 LB: > { %s1160_s9 = sadd.s32 4294967295, %s1072_s30   ;;  %s867_s10 = sadd.s32 4294967294, %s1072_s30   ;;  %s1072_s30 = sphi %s1145_s30, %s1510_s30   ;;  %s1068_s29 = sphi %s1143_s29, %s1509_s29   ;;  %s1064_s28 = sphi %s1141_s28, %s1508_s28   ;;  %s1060_s27 = sphi %s1139_s27, %s1507_s27  }
   0x6   : > { %s1164_s11 = sadd.s32 1, %s1072_s30   ;;  %s201_s12 = sadd.s32 1, %s1068_s29 }
   0x7   : > { %s198_s13 = ssub.s32 %s1072_s30, %s1164_s11  ;;  %p211_p0 = scmp.ne.s32.totalorder %s1068_s29, %s1064_s28 }
   0x8   : > { %p199_p1 = scmp.eq.s32.totalorder %s198_s13, 0  ;;  %p212_p2 = scmp.eq.s32.totalorder %s1160_s9, 1 }
   0x9   : > { %p217_p3 = scmp.ne.s32.totalorder %s1064_s28, %s1060_s27  ;;  %p218_p4 = scmp.eq.s32.totalorder %s867_s10, 1 }
   0xa   : > { %s1175_s14 = scalar_select %p199_p1, %s1068_s29, %s201_s12  }
   0xb   : > { %p1177_p5 = por %p212_p2, %p211_p0  ;;  %p1181_p6 = por %p218_p4, %p217_p3 }
   0xc   : > { %p870_p7 = scmp.ge.s32.totalorder %s1072_s30, 1  ;;  %p265_p8 = scmp.lt.s32.totalorder %s1072_s30, 3 }
   0xe   : > { %p266_p9 = pnand %p870_p7, %p265_p8 }
   0xf   : > { %p299_p10 = scmp.lt.s32.totalorder (!%p266_p9), %s1160_s9, 1  ;;  %v309_v0 = vld [vmem:[%s1485_s3] sm:$0xff] (!%p266_p9)  ;;  %v1074_v1 = vmov (!%p266_p9), 0.0   ;;  %v1075_v2 = vmov (!%p266_p9), 0   ;;  %v1076_v4 = vmov (!%p266_p9), 1   ;;  %s1494_s0 = sld [smem:[#allocation5_spill]] (!%p266_p9)  ;;  %v403_v45 = vlaneseq (!%p266_p9) }
  0x10   : > { %269 = sbr.rel (%p266_p9) target bundleno = 746 (0x2ea), region = 52  ;;  %383 = vmatprep.mubr.f32.mxu0 (!%p266_p9), %v1074_v1  ;;  %951 = vset.pattern.permute.xlu0 (!%p266_p9), %v1075_v2  ;;  %v442_v3 = vld [vmem:[%s1486_s4] sm:$0xff] (!%p266_p9)  ;;  %vm315_vm0 = vcmask (!%p266_p9), 64512   ;;  %v1077_v8 = vmov (!%p266_p9), 3   ;;  %v1078_v9 = vmov (!%p266_p9), 4   ;;  %v1079_v10 = vmov (!%p266_p9), 2  }
  0x11   : > { %312 = vperm.xlu0 (!%p266_p9), %951, %v309_v0   ;;  %952 = vset.pattern.permute.xlu1 (!%p266_p9), %v1076_v4  ;;  %v308_v7 = vld [vmem:[%s1484_s2] sm:$0xff] (!%p266_p9)  ;;  %v1080_v11 = vmov (!%p266_p9), 5   ;;  %v1081_v12 = vmov (!%p266_p9), 7   ;;  %v1082_v13 = vmov (!%p266_p9), 6   ;;  %v1083_v14 = vmov (!%p266_p9), 8   ;;  %s1084_s12 = smov (!%p266_p9), 16  }
  0x12   : > { %462 = vperm.xlu1 (!%p266_p9), %952, %v442_v3   ;;  %716 = vmatprep.mubr.f32.mxu1 (!%p266_p9), %v1074_v1  ;;  %s1085_s13 = smov (!%p266_p9), 17   ;;  %s1086_s17 = smov (!%p266_p9), 113   ;;  %v585_v32 = vld [vmem:[%s1487_s5] sm:$0xff] (!%p266_p9)  ;;  %v611_v34 = vld [vmem:[%s1489_s7 + $0x10] sm:$0xff] (!%p266_p9)  ;;  %v610_v35 = vld [vmem:[%s1489_s7 + $0x8] sm:$0xff] (!%p266_p9)  ;;  %v404_v47 = vshrl.u32 (!%p266_p9), %v403_v45, 7 }
  0x13   : > { %s1087_s18 = smov (!%p266_p9), 15   ;;  %s1089_s20 = smov (!%p266_p9), 1   ;;  %v609_v33 = vld [vmem:[%s1489_s7] sm:$0xff] (!%p266_p9)  ;;  %v612_v36 = vld [vmem:[%s1489_s7 + $0x18] sm:$0xff] (!%p266_p9)  ;;  %v1271_v60 = vand.u32 (!%p266_p9), 127, %v403_v45 }
  0x14   : > { %s1090_s21 = smov (!%p266_p9), 112   ;;  %v875_v50 = vld [vmem:[%s1483_s1 + $0x1] ss:$2 sm:$0x3] (!%p266_p9)  ;;  %v405_v51 = vsub.s32 (!%p266_p9), 0, %v404_v47  ;;  %v409_v53 = vsub.s32 (!%p266_p9), 1, %v404_v47 }
  0x15   : > { %954 = vset.pattern.permute.xlu0 (!%p266_p9), %v1077_v8  ;;  %v402_v52 = vld [vmem:[%s1483_s1] ss:$2 sm:$0x3] (!%p266_p9)  ;;  %vm456_vm5 = vcmp.lt.s32.totalorder (!%p266_p9), %v1271_v60, 16  ;;  %vm435_vm6 = vcmp.lt.s32.totalorder (!%p266_p9), %v1271_v60, 17  ;;  %vm473_vm11 = vcmp.lt.s32.totalorder (!%p266_p9), %v1271_v60, 15 }
  0x16   : > { %498 = vperm.xlu0 (!%p266_p9), %954, %v442_v3   ;;  %953 = vset.pattern.permute.xlu1 (!%p266_p9), %v1079_v10  ;;  %v1263_v55 = vrot.slane (!%p266_p9), %v875_v50, %v405_v51  ;;  %v1265_v57 = vrot.slane (!%p266_p9), %v875_v50, %v409_v53  ;;  %v1267_v58 = vrot.slane (!%p266_p9), %v402_v52, %v405_v51  ;;  %vm492_vm14 = vcmp.lt.s32.totalorder (!%p266_p9), %v1271_v60, 1  ;;  %v607_v47 = vld [vmem:[%s1488_s6 + $0x10] sm:$0xff] (!%p266_p9)  ;;  %s296_s23 = sand.u32 (!%p266_p9), 1, %s1064_s28  }
  0x17   : > { %s300_s19 = scalar_select %p299_p10, %s1160_s9, 1  ;;  %481 = vperm.xlu1 %953, %v442_v3   ;;  %v1269_v59 = vrot.slane %v402_v52, %v409_v53  ;;  %vm517_vm15 = vcmp.lt.s32.totalorder %v1271_v60, 127 }
  0x18   : > { %vm421_vm1 = vcmp.ge.s32.totalorder %v1267_v58, 1  ;;  %vm425_vm2 = vcmp.ge.s32.totalorder %v1263_v55, 1  ;;  %vm426_vm4 = vcmp.ge.s32.totalorder %v1265_v57, 1  ;;  %vm423_vm8 = vcmp.le.s32.totalorder %v1267_v58, 14 }
  0x19   : > { %s885_s22 = sshll.u32 %s300_s19, 5  ;;  %s1088_s19 = smov 127   ;;  %vm422_vm3 = vcmp.ge.s32.totalorder %v1269_v59, 1  ;;  %vm1283_vm7 = vmand %vm425_vm2, %vm421_vm1  ;;  %vm424_vm10 = vcmp.le.s32.totalorder %v1269_v59, 14 }
  0x1a   : > { %s1200_s25 = scalar_lea.vmem %s1494_s0, %s885_s22  ;;  %955 = vset.pattern.permute.xlu0 %v1078_v9  ;;  %vm1292_vm9 = vmand %vm426_vm4, %vm422_vm3 }
  0x1b   : > { %v307_v5 = vld [vmem:[%s1200_s25 + $0x18] sm:$0xff]  ;;  %v306_v6 = vld [vmem:[%s1200_s25 + $0x10] sm:$0xff]  ;;  %506 = vperm.xlu0 %955, %v442_v3   ;;  %959 = vset.pattern.permute.xlu1 %v1081_v12  ;;  %vm1302_vm12 = vmand %vm425_vm2, %vm423_vm8 }
  0x1c   : > { %319 = vmatprep.subr.mxu0 %v307_v5  ;;  %559 = vperm.xlu1 %959, %v442_v3   ;;  %vm1310_vm13 = vmand %vm426_vm4, %vm424_vm10 }
  0x1d   : > { %320 = vmatpush1.msra.mxu0 %v306_v6 }
  0x1e   : > { %874 = vmatmul.mubr.msk.f32.vlgmr.msra.gmra.mrb[0].mxu0 %vm315_vm0, %v308_v7  ;;  %vm427_vm0 = vcmp.le.s32.totalorder %v1263_v55, 14 }
  0x1f   : > { %710 = vmatprep.mubr.f32.mxu0 %v1074_v1  ;;  %956 = vset.pattern.permute.xlu0 %v1080_v11 }
  0x20   : > { %523 = vperm.xlu0 %956, %v442_v3   ;;  %960 = vset.pattern.permute.xlu1 %v1083_v14 }
  0x21   : > { %578 = vperm.xlu1 %960, %v442_v3  }
  0x24   : > { %957 = vset.pattern.permute.xlu0 %v1082_v13 }
  0x25   : > { %542 = vperm.xlu0 %957, %v442_v3   ;;  %961 = vset.pattern.permute.xlu1 %v1075_v2 }
  0x29   : > { %958 = vset.pattern.permute.xlu0 %v1075_v2 }
  0x2a   : > { %445 = vperm.xlu0 %958, %v442_v3  }
  0x90   : > { %v313_v15 = vpop.permute.xlu0 %312 }
  0x91   : > { %v463_v37 = vpop.permute.xlu1 %462 }
  0x95   : > { %v1247_v40 = vpop.permute.xlu0 %498 }
  0x96   : > { %v482_v38 = vpop.permute.xlu1 %481 }
  0x9a   : > { %v1251_v42 = vpop.permute.xlu0 %506 }
  0x9b   : > { %v1245_v39 = vpop.permute.xlu1 %559 }
  0x9f   : > { %v1253_v44 = vpop.permute.xlu0 %523 }
  0xa0   : > { %v1249_v41 = vpop.permute.xlu1 %578 }
  0xa4   : > { %v1255_v48 = vpop.permute.xlu0 %542 }
  0xa9   : > { %v446_v56 = vpop.permute.xlu0 %445 }
  0xf1   : > { %v385_v16 = vpop.f32.mrb[0].mxu0 }
  0xf2   : > { %v386_v17 = vadd.f32 %v385_v16, %v313_v15  ;;  %v387_v18 = vpop.f32.mrb[1].mxu0 }
  0xf3   : > { %v388_v19 = vadd.f32 %v387_v18, %v313_v15 }
  0xf4   : > { %v390_v20 = vsub.f32 0.0, %v386_v17 }
  0xf5   : > { %v391_v21 = vsub.f32 0.0, %v388_v19 }
  0xf6   : > { %v392_v22 = vmul.f32 1.442695, %v390_v20 }
  0xf7   : > { %v394_v23 = vmul.f32 1.442695, %v391_v21 }
  0xf8   : > { %962 = vpow2.f32 %v392_v22 }
  0xf9   : > { %964 = vpow2.f32 %v394_v23 }
 0x102   : > { %v963_v24 = vpop.eup %962 }
 0x103   : > { %v396_v25 = vadd.f32 1.0, %v963_v24  ;;  %v965_v26 = vpop.eup %964 }
 0x104   : > { %v397_v27 = vadd.f32 1.0, %v965_v26 }
 0x105   : > { %966 = vrcp.f32 %v396_v25 }
 0x106   : > { %968 = vrcp.f32 %v397_v27 }
 0x10f   : > { %v967_v28 = vpop.eup %966 }
 0x110   : > { %v1208_v29 = vmul.f32 %v967_v28, %v386_v17  ;;  %v969_v30 = vpop.eup %968 }
 0x111   : > { %v1215_v31 = vmul.f32 %v969_v30, %v388_v19 }
 0x112   : > { %452 = vrot.lane.b32.xlu0 %v1208_v29, %s1084_s12  ;;  %429 = vrot.lane.b32.xlu1 %v1208_v29, %s1085_s13  ;;  %v509_v51 = vmul.f32 %v1251_v42, %v1208_v29 }
 0x113   : > { %v510_v52 = vmul.f32 %v1251_v42, %v1215_v31 }
 0x116   : > { %530 = vrot.lane.b32.xlu0 %v1208_v29, %s1086_s17  ;;  %469 = vrot.lane.b32.xlu1 %v1208_v29, %s1087_s18 }
 0x11a   : > { %515 = vrot.lane.b32.xlu0 %v1215_v31, %s1088_s19  ;;  %488 = vrot.lane.b32.xlu1 %v1208_v29, %s1089_s20 }
 0x11e   : > { %549 = vrot.lane.b32.xlu0 %v1208_v29, %s1090_s21  ;;  %513 = vrot.lane.b32.xlu1 %v1208_v29, %s1088_s19  ;;  %s1091_s19 = smov 111  }
 0x122   : > { %588 = vperm.xlu0 %958, %v585_v32   ;;  %431 = vrot.lane.b32.xlu1 %v1215_v31, %s1085_s13 }
 0x126   : > { %615 = vperm.xlu0 %958, %v609_v33   ;;  %454 = vrot.lane.b32.xlu1 %v1215_v31, %s1084_s12 }
 0x12a   : > { %625 = vperm.xlu0 %958, %v611_v34   ;;  %471 = vrot.lane.b32.xlu1 %v1215_v31, %s1087_s18 }
 0x12e   : > { %490 = vrot.lane.b32.xlu1 %v1215_v31, %s1089_s20  ;;  %s886_s20 = sshll.u32 %s1160_s9, 10  ;;  %s1440_s9 = scalar_lea.sflag [#allocation3], %s296_s23 }
 0x12f   : > { %s1434_s10 = scalar_lea.hbm %s1490_s8, %s886_s20 }
 0x132   : > { %566 = vrot.lane.b32.xlu1 %v1208_v29, %s1091_s19 }
 0x136   : > { %532 = vrot.lane.b32.xlu1 %v1215_v31, %s1086_s17  ;;  %s871_s17 = sshll.u32 %s296_s23, 6 }
 0x137   : > { %s298_s18 = scalar_lea.vmem [#allocation2], %s871_s17 }
 0x13a   : > { %551 = vrot.lane.b32.xlu1 %v1215_v31, %s1090_s21  ;;  %s805_s21 = sshll.u32 %s298_s18, 4  ;;  %s1436_s21 = int_to_ptr.vmem [resolvable:$true] %s805_s21 }
 0x13e   : > { %568 = vrot.lane.b32.xlu1 %v1215_v31, %s1091_s19  ;;  %s1010_s19 = scalar_lea.vmem %s1436_s21, 1024 }
 0x13f   : > { %p1011_p11 = scmp.ne.s32.totalorder %s1436_s21, %s1010_s19 }
 0x141   : > { %p1012_p12 = pnand %p1011_p11, %p1177_p5 }
 0x142   : > { %620 = vperm.xlu1 %961, %v610_v35  }
 0x143   : > { %p1013_p13 = pneg %p1012_p12 }
 0x146   : > { %630 = vperm.xlu1 %961, %v612_v36  }
 0x184   : > { %v430_v43 = vpop.permute.xlu1 %429  ;;  %v453_v62 = vpop.permute.xlu0 %452 }
 0x188   : > { %v470_v46 = vpop.permute.xlu1 %469  ;;  %v531_v18 = vpop.permute.xlu0 %530 }
 0x18c   : > { %v489_v49 = vpop.permute.xlu1 %488 }
 0x190   : > { %v514_v54 = vpop.permute.xlu1 %513 }
 0x194   : > { %v432_v61 = vpop.permute.xlu1 %431 }
 0x195   : > { %v436_v5 = vsel %vm435_vm6, %v430_v43, %v432_v61  ;;  %v437_v6 = vsel %vm435_vm6, %v432_v61, %v430_v43 }
 0x196   : > { %v440_v12 = vsel %vm1283_vm7, %v437_v6, 0.0  ;;  %v441_v13 = vsel %vm1292_vm9, %v436_v5, 0.0  ;;  %vm573_vm7 = vmand %vm427_vm0, %vm423_vm8 }
 0x197   : > { %v448_v21 = vmul.f32 %v446_v56, %v440_v12  ;;  %v449_v22 = vmul.f32 %v446_v56, %v441_v13 }
 0x198   : > { %v455_v0 = vpop.permute.xlu1 %454 }
 0x199   : > { %v457_v3 = vsel %vm456_vm5, %v453_v62, %v455_v0  ;;  %v458_v4 = vsel %vm456_vm5, %v455_v0, %v453_v62  ;;  %vm1341_vm5 = vmand %vm427_vm0, %vm421_vm1 }
 0x19a   : > { %v459_v9 = vsel %vm425_vm2, %v458_v4, 0.0  ;;  %v460_v10 = vsel %vm426_vm4, %v457_v3, 0.0  ;;  %vm428_vm2 = vcmp.le.s32.totalorder %v1265_v57, 14  ;;  %vm534_vm4 = vcmp.lt.s32.totalorder %v1271_v60, 113 }
 0x19b   : > { %v465_v19 = vmul.f32 %v463_v37, %v459_v9  ;;  %v466_v20 = vmul.f32 %v463_v37, %v460_v10  ;;  %v516_v37 = vpop.permute.xlu0 %515  ;;  %vm1349_vm6 = vmand %vm428_vm2, %vm422_vm3 }
 0x19c   : > { %v472_v11 = vpop.permute.xlu1 %471  ;;  %v518_v45 = vsel %vm517_vm15, %v514_v54, %v516_v37  ;;  %vm574_vm9 = vmand %vm428_vm2, %vm424_vm10 }
 0x19d   : > { %v474_v14 = vsel %vm473_vm11, %v470_v46, %v472_v11  ;;  %v475_v15 = vsel %vm473_vm11, %v472_v11, %v470_v46  ;;  %v467_v32 = vadd.f32 %v465_v19, %v448_v21  ;;  %v468_v33 = vadd.f32 %v466_v20, %v449_v22 }
 0x19e   : > { %v478_v16 = vsel %vm1302_vm12, %v475_v15, 0.0  ;;  %v479_v17 = vsel %vm1310_vm13, %v474_v14, 0.0  ;;  %v519_v46 = vsel %vm517_vm15, %v516_v37, %v514_v54  ;;  %v520_v54 = vsel %vm423_vm8, %v518_v45, 0.0  ;;  %v605_v45 = vld [vmem:[%s1488_s6] sm:$0xff] }
 0x19f   : > { %v484_v24 = vmul.f32 %v482_v38, %v478_v16  ;;  %v485_v25 = vmul.f32 %v482_v38, %v479_v17  ;;  %v521_v56 = vsel %vm424_vm10, %v519_v46, 0.0  ;;  %v550_v31 = vpop.permute.xlu0 %549  ;;  %v526_v42 = vmul.f32 %v1253_v44, %v520_v54  ;;  %v606_v46 = vld [vmem:[%s1488_s6 + $0x8] sm:$0xff] }
 0x1a0   : > { %v491_v23 = vpop.permute.xlu1 %490  ;;  %v527_v3 = vmul.f32 %v1253_v44, %v521_v56  ;;  %vm633_vm8 = vcmask 130048  }
 0x1a1   : > { %v493_v26 = vsel %vm492_vm14, %v489_v49, %v491_v23  ;;  %v494_v27 = vsel %vm492_vm14, %v491_v23, %v489_v49  ;;  %v486_v38 = vadd.f32 %v484_v24, %v467_v32  ;;  %v487_v43 = vadd.f32 %v485_v25, %v468_v33  ;;  %v304_v33 = vld [vmem:[%s1200_s25] sm:$0xff] }
 0x1a2   : > { %v495_v28 = vsel %vm421_vm1, %v494_v27, 0.0  ;;  %v496_v30 = vsel %vm422_vm3, %v493_v26, 0.0  ;;  %vm553_vm1 = vcmp.lt.s32.totalorder %v1271_v60, 112  ;;  %vm570_vm3 = vcmp.lt.s32.totalorder %v1271_v60, 111 }
 0x1a3   : > { %v501_v34 = vmul.f32 %v1247_v40, %v495_v28  ;;  %v502_v35 = vmul.f32 %v1247_v40, %v496_v30  ;;  %v589_v22 = vpop.permute.xlu0 %588 }
 0x1a4   : > { %v567_v36 = vpop.permute.xlu1 %566 }
 0x1a5   : > { %v503_v49 = vadd.f32 %v501_v34, %v486_v38  ;;  %v504_v40 = vadd.f32 %v502_v35, %v487_v43  ;;  %v305_v35 = vld [vmem:[%s1200_s25 + $0x8] sm:$0xff]  ;;  %s1092_s25 = smov [#allocation2]  }
 0x1a6   : > { %s1014_s13 = sshll.u32 %s1092_s25, 4  ;;  %s1015_s13 = int_to_ptr.vmem [resolvable:$false] %s1014_s13 }
 0x1a7   : > { %v511_v29 = vadd.f32 %v509_v51, %v503_v49  ;;  %v512_v2 = vadd.f32 %v510_v52, %v504_v40  ;;  %v608_v49 = vld [vmem:[%s1488_s6 + $0x18] sm:$0xff]  ;;  %v616_v40 = vpop.permute.xlu0 %615  ;;  %s1016_s22 = scalar_lea.vmem %s1015_s13, 2048  ;;  %p1017_p0 = scmp.lt.s32.totalorder %s1436_s21, %s1015_s13 }
 0x1a8   : > { %v533_v53 = vpop.permute.xlu1 %532  ;;  %p1018_p1 = scmp.lt.s32.totalorder %s1016_s22, %s1010_s19 }
 0x1a9   : > { %v535_v61 = vsel %vm534_vm4, %v531_v18, %v533_v53  ;;  %v536_v62 = vsel %vm534_vm4, %v533_v53, %v531_v18  ;;  %v529_v44 = vadd.f32 %v527_v3, %v512_v2  ;;  %v528_v11 = vadd.f32 %v526_v42, %v511_v29 }
 0x1aa   : > { %v539_v63 = vsel %vm1341_vm5, %v535_v61, 0.0  ;;  %v540_v0 = vsel %vm1349_vm6, %v536_v62, 0.0  ;;  %p1019_p2 = por %p1018_p1, %p1017_p0 }
 0x1ab   : > { %v545_v5 = vmul.f32 %v1255_v48, %v539_v63  ;;  %v546_v6 = vmul.f32 %v1255_v48, %v540_v0  ;;  %v626_v29 = vpop.permute.xlu0 %625 }
 0x1ac   : > { %v552_v4 = vpop.permute.xlu1 %551  ;;  %p1020_p3 = pnand %p1019_p2, %p1013_p13 }
 0x1ad   : > { %v554_v7 = vsel %vm553_vm1, %v550_v31, %v552_v4  ;;  %v555_v8 = vsel %vm553_vm1, %v552_v4, %v550_v31  ;;  %v547_v14 = vadd.f32 %v545_v5, %v528_v11  ;;  %v548_v15 = vadd.f32 %v546_v6, %v529_v44 }
 0x1ae   : > { %v556_v9 = vsel %vm427_vm0, %v554_v7, 0.0  ;;  %v557_v10 = vsel %vm428_vm2, %v555_v8, 0.0 }
 0x1af   : > { %v562_v12 = vmul.f32 %v1245_v39, %v556_v9  ;;  %v563_v48 = vmul.f32 %v1245_v39, %v557_v10 }
 0x1b0   : > { %v569_v13 = vpop.permute.xlu1 %568 }
 0x1b1   : > { %v571_v60 = vsel %vm570_vm3, %v567_v36, %v569_v13  ;;  %v572_v16 = vsel %vm570_vm3, %v569_v13, %v567_v36  ;;  %v564_v55 = vadd.f32 %v562_v12, %v547_v14  ;;  %v565_v18 = vadd.f32 %v563_v48, %v548_v15 }
 0x1b2   : > { %v575_v58 = vsel %vm573_vm7, %v571_v60, 0.0  ;;  %v576_v17 = vsel %vm574_vm9, %v572_v16, 0.0 }
 0x1b3   : > { %v581_v19 = vmul.f32 %v1249_v41, %v575_v58  ;;  %v582_v20 = vmul.f32 %v1249_v41, %v576_v17 }
 0x1b5   : > { %v583_v21 = vadd.f32 %v581_v19, %v564_v55  ;;  %v584_v39 = vadd.f32 %v582_v20, %v565_v18 }
 0x1b7   : > { %v591_v59 = vadd.f32 %v589_v22, %v583_v21  ;;  %v592_v57 = vadd.f32 %v589_v22, %v584_v39 }
 0x1b9   : > { %v593_v23 = vsub.f32 0.0, %v591_v59  ;;  %v594_v24 = vsub.f32 0.0, %v592_v57 }
 0x1bb   : > { %v595_v25 = vmul.f32 1.442695, %v593_v23  ;;  %v597_v26 = vmul.f32 1.442695, %v594_v24 }
 0x1bd   : > { %970 = vpow2.f32 %v595_v25 }
 0x1be   : > { %972 = vpow2.f32 %v597_v26 }
 0x1c1   : > { %v621_v50 = vpop.permute.xlu1 %620 }
 0x1c5   : > { %v631_v44 = vpop.permute.xlu1 %630 }
 0x1c7   : > { %v971_v27 = vpop.eup %970 }
 0x1c8   : > { %v973_v28 = vpop.eup %972  ;;  %v599_v30 = vadd.f32 1.0, %v971_v27 }
 0x1c9   : > { %v600_v32 = vadd.f32 1.0, %v973_v28 }
 0x1ca   : > { %974 = vrcp.f32 %v599_v30 }
 0x1cb   : > { %976 = vrcp.f32 %v600_v32 }
 0x1d4   : > { %v975_v41 = vpop.eup %974 }
 0x1d5   : > { %v977_v34 = vpop.eup %976  ;;  %v603_v36 = vmul.f32 %v975_v41, %v591_v59 }
 0x1d6   : > { %v604_v37 = vmul.f32 %v977_v34, %v592_v57 }
 0x1d7   : > { %v889_v38 = vpack.c.bf16 %v603_v36, %v304_v33 }
 0x1d8   : > { %v887_v43 = vpack.c.bf16 %v604_v37, %v305_v35 }
 0x1da   : > { %888 = vmatprep.subr.bf16.mxu0 %v887_v43  ;;  %891 = vmatprep.subr.bf16.mxu1 %v887_v43 }
 0x1db   : > { %890 = vmatpush1.bf16.msra.mxu0 %v889_v38  ;;  %892 = vmatpush1.bf16.msra.mxu1 %v889_v38 }
 0x1de   : > { %876 = vmatmul.mubr.msk.f32.vlgmr.msra.gmra.mrb[2].mxu0 %vm633_vm8, %v605_v45  ;;  %877 = vmatmul.mubr.msk.f32.vlgmr.msra.gmra.mrb[0].mxu1 %vm633_vm8, %v606_v46 }
 0x1df   : > { %722 = vmatprep.mubr.f32.mxu1 %v1074_v1 }
 0x1e2   : > { %878 = vmatmul.mubr.msk.f32.gmra.mrb[2].mxu1 %vm633_vm8, %v607_v47 }
 0x1e3   : > { %728 = vmatprep.mubr.f32.mxu1 %v1074_v1 }
 0x1e6   : > { %879 = vmatmul.mubr.msk.f32.gmra.mrb[4].mxu1 %vm633_vm8, %v608_v49 }
 0x2b1   : > { %v712_v51 = vpop.f32.mrb[2].mxu0  ;;  %v718_v52 = vpop.f32.mrb[0].mxu1 }
 0x2b2   : > { %v1403_v53 = vadd.f32 %v712_v51, %v616_v40  ;;  %v1405_v54 = vadd.f32 %v718_v52, %v621_v50  ;;  %v714_v56 = vpop.f32.mrb[3].mxu0  ;;  %v720_v61 = vpop.f32.mrb[1].mxu1 }
 0x2b3   : > { %v1407_v62 = vadd.f32 %v714_v56, %v616_v40  ;;  %v1409_v63 = vadd.f32 %v720_v61, %v621_v50 }
 0x2b4   : > { %v735_v1 = vsub.f32 0.0, %v1403_v53  ;;  %v737_v0 = vsub.f32 0.0, %v1405_v54 }
 0x2b5   : > { %v736_v2 = vsub.f32 0.0, %v1407_v62  ;;  %v738_v31 = vsub.f32 0.0, %v1409_v63  ;;  %v724_v42 = vpop.f32.mrb[2].mxu1 }
 0x2b6   : > { %v743_v3 = vmul.f32 1.442695, %v735_v1  ;;  %v747_v4 = vmul.f32 1.442695, %v737_v0  ;;  %v1415_v5 = vadd.f32 %v724_v42, %v626_v29  ;;  %v726_v6 = vpop.f32.mrb[3].mxu1 }
 0x2b7   : > { %v745_v7 = vmul.f32 1.442695, %v736_v2  ;;  %v749_v8 = vmul.f32 1.442695, %v738_v31  ;;  %v1417_v9 = vadd.f32 %v726_v6, %v626_v29 }
 0x2b8   : > { %978 = vpow2.f32 %v743_v3  ;;  %v739_v10 = vsub.f32 0.0, %v1415_v5 }
 0x2b9   : > { %980 = vpow2.f32 %v747_v4  ;;  %v740_v11 = vsub.f32 0.0, %v1417_v9  ;;  %v730_v12 = vpop.f32.mrb[4].mxu1 }
 0x2ba   : > { %982 = vpow2.f32 %v745_v7  ;;  %v751_v48 = vmul.f32 1.442695, %v739_v10  ;;  %v731_v13 = vadd.f32 %v730_v12, %v631_v44  ;;  %v732_v14 = vpop.f32.mrb[5].mxu1 }
 0x2bb   : > { %984 = vpow2.f32 %v749_v8  ;;  %v753_v15 = vmul.f32 1.442695, %v740_v11  ;;  %v733_v60 = vadd.f32 %v732_v14, %v631_v44 }
 0x2bc   : > { %986 = vpow2.f32 %v751_v48  ;;  %v741_v16 = vsub.f32 0.0, %v731_v13 }
 0x2bd   : > { %988 = vpow2.f32 %v753_v15  ;;  %v742_v58 = vsub.f32 0.0, %v733_v60 }
 0x2be   : > { %v755_v17 = vmul.f32 1.442695, %v741_v16 }
 0x2bf   : > { %v757_v55 = vmul.f32 1.442695, %v742_v58 }
 0x2c0   : > { %990 = vpow2.f32 %v755_v17 }
 0x2c1   : > { %992 = vpow2.f32 %v757_v55 }
 0x2c2   : > { %v979_v18 = vpop.eup %978 }
 0x2c3   : > { %v981_v19 = vpop.eup %980  ;;  %v759_v20 = vadd.f32 1.0, %v979_v18 }
 0x2c4   : > { %v983_v21 = vpop.eup %982  ;;  %v761_v39 = vadd.f32 1.0, %v981_v19 }
 0x2c5   : > { %v985_v22 = vpop.eup %984  ;;  %994 = vrcp.f32 %v759_v20  ;;  %v760_v59 = vadd.f32 1.0, %v983_v21 }
 0x2c6   : > { %v987_v57 = vpop.eup %986  ;;  %996 = vrcp.f32 %v761_v39  ;;  %v762_v23 = vadd.f32 1.0, %v985_v22 }
 0x2c7   : > { %v989_v24 = vpop.eup %988  ;;  %998 = vrcp.f32 %v760_v59  ;;  %v763_v25 = vadd.f32 1.0, %v987_v57 }
 0x2c8   : > { %1000 = vrcp.f32 %v762_v23  ;;  %v764_v26 = vadd.f32 1.0, %v989_v24 }
 0x2c9   : > { %1002 = vrcp.f32 %v763_v25 }
 0x2ca   : > { %v991_v27 = vpop.eup %990  ;;  %1004 = vrcp.f32 %v764_v26 }
 0x2cb   : > { %v993_v28 = vpop.eup %992  ;;  %v765_v30 = vadd.f32 1.0, %v991_v27 }
 0x2cc   : > { %v766_v32 = vadd.f32 1.0, %v993_v28 }
 0x2cd   : > { %1006 = vrcp.f32 %v765_v30 }
 0x2ce   : > { %1008 = vrcp.f32 %v766_v32 }
 0x2cf   : > { %v995_v41 = vpop.eup %994 }
 0x2d0   : > { %v997_v33 = vpop.eup %996  ;;  %v775_v34 = vmul.f32 %v995_v41, %v1403_v53 }
 0x2d1   : > { %v999_v35 = vpop.eup %998  ;;  %v777_v36 = vmul.f32 %v997_v33, %v1405_v54 }
 0x2d2   : > { %v1001_v37 = vpop.eup %1000  ;;  %783 = vst [vmem:[%s298_s18] sm:$0xff] %v775_v34  ;;  %v776_v38 = vmul.f32 %v999_v35, %v1407_v62 }
 0x2d3   : > { %v1003_v43 = vpop.eup %1002  ;;  %785 = vst [vmem:[%s298_s18 + $0x10] sm:$0xff] %v777_v36  ;;  %v778_v45 = vmul.f32 %v1001_v37, %v1409_v63 }
 0x2d4   : > { %v1005_v46 = vpop.eup %1004  ;;  %784 = vst [vmem:[%s298_s18 + $0x8] sm:$0xff] %v776_v38  ;;  %v779_v47 = vmul.f32 %v1003_v43, %v1415_v5 }
 0x2d5   : > { %786 = vst [vmem:[%s298_s18 + $0x18] sm:$0xff] %v778_v45  ;;  %v780_v49 = vmul.f32 %v1005_v46, %v1417_v9 }
 0x2d6   : > { %787 = vst [vmem:[%s298_s18 + $0x20] sm:$0xff] %v779_v47 }
 0x2d7   : > { %v1007_v40 = vpop.eup %1006  ;;  %788 = vst [vmem:[%s298_s18 + $0x28] sm:$0xff] %v780_v49 }
 0x2d8   : > { %v1009_v50 = vpop.eup %1008  ;;  %v781_v51 = vmul.f32 %v1007_v40, %v731_v13 }
 0x2d9   : > { %v782_v52 = vmul.f32 %v1009_v50, %v733_v60 }
 0x2da   : > { %789 = vst [vmem:[%s298_s18 + $0x30] sm:$0xff] %v781_v51 }
 0x2db   : > { %790 = vst [vmem:[%s298_s18 + $0x38] sm:$0xff] %v782_v52 }
 0x2dc   : > { %1023 = shalt.err (!%p1020_p3)
}
 0x2dd   : > { %s1024_s0 = scalar_lea.hbm %s1434_s10, 1024  ;;  %s1028_s18 = scalar_lea.hbm %s1490_s8, 2048 }
 0x2de   : > { %p1025_p4 = scmp.ne.s32.totalorder %s1434_s10, %s1024_s0  ;;  %p1029_p9 = scmp.lt.u32.totalorder %s1434_s10, %s1490_s8 }
 0x2df   : > { %p1030_p10 = scmp.lt.u32.totalorder %s1028_s18, %s1024_s0  ;;  %p1032_p12 = scmp.lt.u32.totalorder %s1024_s0, %s1434_s10 }
 0x2e0   : > { %p1026_p7 = pnand %p1025_p4, %p1177_p5 }
 0x2e1   : > { %p1031_p11 = por %p1030_p10, %p1029_p9 }
 0x2e2   : > { %p1027_p8 = pneg %p1026_p7 }
 0x2e3   : > { %p1033_p13 = por %p1032_p12, %p1031_p11 }
 0x2e5   : > { %p1034_p0 = pnand %p1033_p13, %p1027_p8 }
 0x2e7   : > { %1037 = shalt.err (!%p1034_p0)
}
 0x2e8   : > { %s1093_s26 = smov 256  }
 0x2e9   : > { %893 = dma.vmem_to_hbm [thread:$0]  (%p1177_p5), %s1436_s21, 1024, %s1434_s10, %s1440_s9, %s1093_s26, %s1093_s26, %s1084_s12  }
 0x2ea PF: > { %p899_p1 = scmp.ge.s32.totalorder %s1072_s30, 2  ;;  %s820_s19 = sand.u32 1, %s1060_s27  }
 0x2eb   : > { %s821_s25 = scalar_lea.sflag [#allocation3], %s820_s19 }
 0x2ec   : > { %p896_p2 = pnand %p899_p1, %p1181_p6 }
 0x2ee   : > { %1055 = dma.done.wait (!%p896_p2), %s821_s25, 1024  }
 0x2ef   : > { %1057 = vsyncadd (!%p896_p2), %s821_s25, 4294966272  ;;  %p18_p3 = scmp.ge.s32.totalorder %s1164_s11, 4   ;;  %s1507_s27 = smov %s1064_s28 }
 0x2f0   : > { %s1508_s28 = smov %s1068_s29  ;;  %s1509_s29 = smov %s1175_s14 }
 0x2f1   : > { %s1510_s30 = smov %s1164_s11  ;;  %20 = sbr.rel (!%p18_p3) target bundleno = 5 (0x5), region = 88 }
 0x2f8   :  { %826 = vsyncpa [#allocation3], 1 }
 0x2f9   :  { %828 = vsyncpa [#allocation3 + $0x1], 1 }

</bundles_post_ra>
